<compile_context>
chip_gen: v7x
topology: tpu7x:2x2x1
jax: 0.10.0
libtpu: 0.0.40
codegen_flags: <defaults>
</compile_context>

<pallas_src>
import functools

import jax
import jax.numpy as jnp
from jax.experimental import pallas as pl
from jax.experimental.pallas import tpu as pltpu


def _round_up(n, m):
    return ((n + m - 1) // m) * m


def _cdiv(a, b):
    return -(-a // b)


# --------------------------------------------------------------------------- #
# Single fused Pallas kernel (integer-code dataflow, scales folded into weights)
# --------------------------------------------------------------------------- #
def _fused_forward_kernel(x_ref, w_ref, b_ref, o_ref, *,
                          bits_in, bits_hidden, bits_out, qmax,
                          row_splits, pool_half):
    f32 = jnp.float32

    # static Python constants (no per-element mul beyond the input scale & final de-quant)
    inv_s_in = (2.0 ** (bits_in - 1)) / qmax
    lo_in = -(2.0 ** (bits_in - 1))
    hi_in = 2.0 ** (bits_in - 1) - 1.0
    code_max = 2.0 ** bits_hidden - 1.0
    lo_out = -(2.0 ** (bits_out - 1))
    hi_out = 2.0 ** (bits_out - 1) - 1.0
    s_out = qmax / (2.0 ** (bits_out - 1))

    b_all = b_ref[...]                                  # (8, col_w) resident bias slab

    def layer(h, k):
        r0, r1 = row_splits[k], row_splits[k + 1]       # static, sublane-aligned offsets
        w = w_ref[r0:r1, :]                             # zero-cost static view of the slab
        return jnp.dot(h, w, preferred_element_type=f32) + b_all[k:k + 1, :]

    def relu_code(z):                                   # QuantReLU in integer-code space
        return jnp.clip(jnp.round(z), 0.0, code_max)

    x = x_ref[...].astype(f32)
    q0 = jnp.clip(jnp.round(x * inv_s_in), lo_in, hi_in)   # input QuantHardTanh -> codes
    h1 = relu_code(layer(q0, 0))                            # conv1 + BN + QuantReLU
    h2 = relu_code(layer(h1, 1))                            # conv2 (even|odd merged, 128-lane)
    p = jnp.maximum(h2[:, :pool_half],
                    h2[:, pool_half:2 * pool_half])         # MaxPool1d(2) + flatten
    f1 = relu_code(layer(p, 2))                              # fc1 + BN + QuantReLU
    f2 = relu_code(layer(f1, 3))                             # fc2 + BN + QuantReLU
    z = layer(f2, 4)                                         # fc3
    q = jnp.clip(jnp.round(z), lo_out, hi_out)               # QuantIdentity -> codes
    o_ref[...] = (q * s_out).astype(o_ref.dtype)             # single de-quant on the way out


# --------------------------------------------------------------------------- #
# Wrapper: one pallas_call, row-tiled "parallel" grid, 2 resident weight slabs
# --------------------------------------------------------------------------- #
def _choose_row_tile(batch):
    Mp = _round_up(max(batch, 8), 8)
    if Mp < 16:
        return Mp, Mp                       # tiny batch: single grid step
    # >=2 grid steps so v7x's two TensorCores both get work; cap the tile so f32
    # intermediates + double-buffered IO stay far below v7x's 64 MiB physical VMEM.
    tm = min(1024, _round_up(_cdiv(Mp, 2), 8))
    Mp = _round_up(Mp, tm)
    return Mp, tm


def fused_forward(x2d, fp, *, bits_in, bits_hidden, bits_out, qmax=2.0):
    B, F = x2d.shape
    in_pad = fp["in_pad"]
    col_w = fp["col_w"]
    Mp, tm = _choose_row_tile(B)
    x2d = jnp.pad(x2d.astype(jnp.float32), ((0, Mp - B), (0, in_pad - F)))

    kern = functools.partial(
        _fused_forward_kernel,
        bits_in=bits_in, bits_hidden=bits_hidden, bits_out=bits_out, qmax=qmax,
        row_splits=fp["row_splits"], pool_half=fp["pool_half"])

    wslab, bslab = fp["Wslab"], fp["bslab"]
    out = pl.pallas_call(
        kern,
        out_shape=jax.ShapeDtypeStruct((Mp, col_w), jnp.float32),
        grid=(Mp // tm,),
        in_specs=[
            pl.BlockSpec((tm, in_pad), lambda i: (i, 0)),        # streamed input rows
            pl.BlockSpec(wslab.shape, lambda i: (0, 0)),         # resident weight slab
            pl.BlockSpec(bslab.shape, lambda i: (0, 0)),         # resident bias slab
        ],
        out_specs=pl.BlockSpec((tm, col_w), lambda i: (i, 0)),   # lane-dense output
        compiler_params=pltpu.CompilerParams(
            dimension_semantics=("parallel",),
            vmem_limit_bytes=32 * 1024 * 1024),
    )(x2d, wslab, bslab)
    return out[:B, :fp["n_out"]]


def quantized_mnist_neq_forward(x, fused_params, cfg):
    B, C_in, L = x.shape
    x2d = x.reshape(B, C_in * L)            # (channel, position) order matches the folding
    return fused_forward(
        x2d, fused_params,
        bits_in=cfg["input_bitwidth"], bits_hidden=cfg["hidden_bitwidth"],
        bits_out=cfg["output_bitwidth"])


# --------------------------------------------------------------------------- #
# Parameter folding (runs ONCE at init, plain JAX, off the hot path):
#   conv -> block-Toeplitz dense, mask & BN into weights, even/odd pool merge,
#   quantizer scales into weights, lane padding, packing into 2 slabs.
# --------------------------------------------------------------------------- #
def prepare_fused_params(P, cfg, qmax=2.0):
    L = cfg["sequence_length"]
    Lp = L // 2
    b_in = cfg["input_bitwidth"]
    b_h = cfg["hidden_bitwidth"]
    b_out = cfg["output_bitwidth"]
    s_in = qmax / (2.0 ** (b_in - 1))
    s_h = qmax / (2.0 ** b_h - 1.0)
    s_out = qmax / (2.0 ** (b_out - 1))

    def conv_as_dense(p, seq_len):
        w_m = p["w"] * p["mask"]                              # (Co, Ci, K)
        Co, Ci, K = w_m.shape
        pad = p["pad"]
        taps = jnp.arange(K)[:, None, None]
        l_in = jnp.arange(seq_len)[None, :, None]
        l_out = jnp.arange(seq_len)[None, None, :]
        sel = (l_in == l_out + taps - pad).astype(jnp.float32)        # (K, L, L) Toeplitz
        Wb = jnp.einsum("oit,tlm->ilom", w_m, sel).reshape(Ci * seq_len, Co * seq_len)
        scale = jnp.repeat(p["scale"], seq_len)               # per-channel BN over positions
        shift = jnp.repeat(p["shift"], seq_len)
        bias = jnp.repeat(p["b"], seq_len)
        return Wb * scale[None, :], bias * scale + shift

    W1, b1 = conv_as_dense(P["conv1"], L)                     # (Ci*L, C1*L)
    W2, b2 = conv_as_dense(P["conv2"], L)                     # (C1*L, C2*L)

    # Merge conv2's even/odd output positions into ONE matmul; columns ordered
    # (channel, pooled_pos) = PyTorch flatten order, so pooling is max of the halves.
    C2 = P["conv2"]["w"].shape[0]
    even_cols = (jnp.arange(C2)[:, None] * L + 2 * jnp.arange(Lp)[None, :]).reshape(-1)
    odd_cols = even_cols + 1
    W2m = jnp.concatenate([W2[:, even_cols], W2[:, odd_cols]], axis=1)
    b2m = jnp.concatenate([b2[even_cols], b2[odd_cols]])

    def linear_folded(p):
        W = (p["w"] * p["mask"]).T * p["scale"][None, :]
        b = p["b"] * p["scale"] + p["shift"]
        return W, b

    W3, b3 = linear_folded(P["fc1"])
    W4, b4 = linear_folded(P["fc2"])
    W5, b5 = linear_folded(P["fc3"])                          # fc3: scale=1, shift=0 (no BN)

    # Fold quantizer scales so activations are integer codes inside the kernel.
    #   W' = W * s_prev / s_curr,  b' = b / s_curr   (hidden scales cancel in W2..W4)
    W1 = W1 * (s_in / s_h)
    b1 = b1 / s_h
    b2m = b2m / s_h
    b3 = b3 / s_h
    b4 = b4 / s_h
    W5 = W5 * (s_h / s_out)
    b5 = b5 / s_out

    LANE = 128
    n_in = W1.shape[0]
    in_pad = _round_up(n_in, LANE)                            # lane-dense input
    pool_half = W2m.shape[1] // 2
    assert pool_half % 8 == 0, "pooled feature count must be sublane-aligned"
    outs = [W1.shape[1], W2m.shape[1], W3.shape[1], W4.shape[1], W5.shape[1]]
    col_w = max(_round_up(o, LANE) for o in outs)             # uniform lane-padded width
    n_out = W5.shape[1]

    def pad2(W, rows):
        Z = jnp.zeros((rows, col_w), jnp.float32)
        return Z.at[:W.shape[0], :W.shape[1]].set(W.astype(jnp.float32))

    # Row counts must match the (padded) activation that feeds each layer; all multiples of 8.
    blocks = [pad2(W1, in_pad),        # conv1: fed by padded input (in_pad lanes)
              pad2(W2m, col_w),        # conv2: fed by h1 (col_w lanes, padded cols are 0-codes)
              pad2(W3, pool_half),     # fc1:   fed by pooled p (pool_half lanes)
              pad2(W4, col_w),         # fc2:   fed by f1
              pad2(W5, col_w)]         # fc3:   fed by f2
    row_splits = [0]
    for blk in blocks:
        row_splits.append(row_splits[-1] + blk.shape[0])
    Wslab = jnp.concatenate(blocks, axis=0)                   # one contiguous (R, col_w) slab

    def padb(b):
        return jnp.zeros((col_w,), jnp.float32).at[:b.shape[0]].set(b.astype(jnp.float32))

    zero_row = jnp.zeros((col_w,), jnp.float32)
    bslab = jnp.stack([padb(b1), padb(b2m), padb(b3), padb(b4), padb(b5),
                       zero_row, zero_row, zero_row])         # (8, col_w), sublane-aligned

    return {
        "Wslab": Wslab, "bslab": bslab,
        "row_splits": tuple(int(r) for r in row_splits),
        "pool_half": int(pool_half),
        "in_pad": int(in_pad), "col_w": int(col_w),
        "n_out": int(n_out),
    }


# --------------------------------------------------------------------------- #
# Raw parameter construction (deterministic, synthetic) — mirrors the module
# --------------------------------------------------------------------------- #
def _sparse_mask_2d(key, out_f, in_f, fan_in):
    rows = []
    for _ in range(out_f):
        key, sub = jax.random.split(key)
        idx = jax.random.permutation(sub, in_f)[:fan_in]
        rows.append(jnp.zeros((in_f,), jnp.float32).at[idx].set(1.0))
    return jnp.stack(rows)


def _sparse_mask_conv(key, c_out, c_in, k, fan_in):
    m = _sparse_mask_2d(key, c_out, c_in, fan_in)             # select input channels
    return jnp.broadcast_to(m[:, :, None], (c_out, c_in, k))


def _bn_fold(key, n):
    kg, kb, km, kv = jax.random.split(key, 4)
    gamma = jax.random.uniform(kg, (n,), jnp.float32, 0.5, 1.5)
    beta = jax.random.normal(kb, (n,), jnp.float32) * 0.1
    mean = jax.random.normal(km, (n,), jnp.float32) * 0.1
    var = jax.random.uniform(kv, (n,), jnp.float32, 0.5, 1.5)
    scale = gamma / jnp.sqrt(var + 1e-5)
    shift = beta - mean * scale
    return scale, shift


def init_params(key, cfg):
    P = {}
    ks = list(jax.random.split(key, 32))
    nxt = iter(ks).__next__

    def conv_p(c_in, c_out, k, fan_in):
        w = jax.random.normal(nxt(), (c_out, c_in, k), jnp.float32) * 0.3
        b = jax.random.normal(nxt(), (c_out,), jnp.float32) * 0.1
        mask = _sparse_mask_conv(nxt(), c_out, c_in, k, fan_in)
        scale, shift = _bn_fold(nxt(), c_out)
        return dict(w=w, b=b, mask=mask, scale=scale, shift=shift, pad=cfg["padding"])

    def lin_p(in_f, out_f, fan_in, bn=True):
        w = jax.random.normal(nxt(), (out_f, in_f), jnp.float32) * 0.2
        b = jax.random.normal(nxt(), (out_f,), jnp.float32) * 0.1
        mask = _sparse_mask_2d(nxt(), out_f, in_f, fan_in)
        if bn:
            scale, shift = _bn_fold(nxt(), out_f)
        else:
            scale, shift = jnp.ones((out_f,), jnp.float32), jnp.zeros((out_f,), jnp.float32)
        return dict(w=w, b=b, mask=mask, scale=scale, shift=shift)

    nn = [cfg["input_length"]] + cfg["hidden_layers"] + [cfg["output_length"]]
    # num_neurons = [4, 8, 8, 8, 32, 32, 10]
    P["conv1"] = conv_p(nn[0], nn[1], cfg["kernel_size"], cfg["input_fanin"])
    P["conv2"] = conv_p(nn[1], nn[2], cfg["kernel_size"], cfg["conv_fanin"])
    # i == len-4 : pooling layer (no params)
    P["fc1"] = lin_p(cfg["1st_layer_in_f"], nn[4], cfg["hidden_fanin"])
    P["fc2"] = lin_p(nn[4], nn[5], cfg["hidden_fanin"])
    P["fc3"] = lin_p(nn[5], nn[6], cfg["output_fanin"], bn=False)
    return P


# --------------------------------------------------------------------------- #
# Pure-JAX reference (layer-by-layer, unfused, unfolded) for the tolerance check
# --------------------------------------------------------------------------- #
def _ref_quant_signed(y, bits, qmax=2.0):
    s = qmax / (2.0 ** (bits - 1))
    q = jnp.clip(jnp.round(y / s), -(2.0 ** (bits - 1)), 2.0 ** (bits - 1) - 1.0)
    return q * s


def _ref_quant_relu(y, bits, qmax=2.0):
    s = qmax / (2.0 ** bits - 1.0)
    return jnp.round(jnp.clip(y, 0.0, qmax) / s) * s


def _ref_conv(x, p, bits):
    B, C_in, L = x.shape
    C_out, _, k = p["w"].shape
    pad = p["pad"]
    xp = jnp.pad(x, ((0, 0), (0, 0), (pad, pad)))
    L_out = L + 2 * pad - k + 1
    cols = jnp.stack([xp[:, :, i:i + L_out] for i in range(k)], axis=-1)
    cols = jnp.transpose(cols, (0, 2, 1, 3)).reshape(B * L_out, C_in * k)
    y = cols @ (p["w"] * p["mask"]).reshape(C_out, C_in * k).T + p["b"][None, :]
    y = y * p["scale"][None, :] + p["shift"][None, :]
    return _ref_quant_relu(y, bits).reshape(B, L_out, C_out).transpose(0, 2, 1)


def _ref_forward(x, P, cfg):
    b_in, b_h, b_out = cfg["input_bitwidth"], cfg["hidden_bitwidth"], cfg["output_bitwidth"]
    B = x.shape[0]
    x = _ref_quant_signed(x, b_in)
    x = _ref_conv(x, P["conv1"], b_h)
    x = _ref_conv(x, P["conv2"], b_h)
    x = jnp.maximum(x[:, :, 0::2], x[:, :, 1::2])
    x = x.reshape(B, -1)

    def lin(v, p, relu, bits):
        y = v @ (p["w"] * p["mask"]).T + p["b"][None, :]
        y = y * p["scale"][None, :] + p["shift"][None, :]
        return _ref_quant_relu(y, bits) if relu else _ref_quant_signed(y, bits)

    x = lin(x, P["fc1"], True, b_h)
    x = lin(x, P["fc2"], True, b_h)
    return lin(x, P["fc3"], False, b_out)


# --------------------------------------------------------------------------- #
if __name__ == "__main__":
    model_config = {
        "input_length": 4,          # conv1d input channels
        "sequence_length": 16,      # conv1d sequence length
        "hidden_layers": [8, 8, 8, 32, 32],
        "output_length": 10,
        "kernel_size": 3,
        "padding": 1,
        "input_bitwidth": 4,
        "hidden_bitwidth": 4,
        "output_bitwidth": 4,
        "input_fanin": 2,
        "conv_fanin": 2,
        "hidden_fanin": 8,
        "output_fanin": 8,
        "1st_layer_in_f": 8 * (16 // 2),   # channels * pooled seq length = 64
    }

    key = jax.random.PRNGKey(0)
    x = jax.random.normal(
        key, (2, model_config["input_length"], model_config["sequence_length"]),
        dtype=jnp.float32)

    raw_params = init_params(jax.random.PRNGKey(42), model_config)
    fused_params = prepare_fused_params(raw_params, model_config)

    fwd = jax.jit(lambda xx: quantized_mnist_neq_forward(xx, fused_params, model_config))
    y = fwd(x)
    jax.block_until_ready(y)

    assert y.shape == (2, model_config["output_length"]), y.shape
    assert bool(jnp.all(jnp.isfinite(y)))

    # Tolerance-asserted reference check (unfused, unfolded pure-JAX path).
    y_ref = _ref_forward(x, raw_params, model_config)
    if not bool(jnp.allclose(y, y_ref, rtol=1e-4, atol=1e-4)):
        # Scale folding reassociates f32 math: tolerate at most isolated 1-LSB
        # quant-grid flips while still catching any real folding/ordering bug.
        out_lsb = 2.0 / (2.0 ** (model_config["output_bitwidth"] - 1))
        diff = jnp.abs(y - y_ref)
        assert float(jnp.max(diff)) <= out_lsb + 1e-3, (y, y_ref)
        assert float(jnp.mean((diff <= 1e-4).astype(jnp.float32))) >= 0.9, (y, y_ref)

    print("KERNEL_OK")
</pallas_src>

<mosaic_0001>
module attributes {stable_mosaic.version = 11 : i64} {
  func.func @_fused_forward_kernel(%arg0: i32, %arg1: memref<8x128xf32, #tpu.memory_space<vmem>>, %arg2: memref<576x128xf32, #tpu.memory_space<vmem>>, %arg3: memref<8x128xf32, #tpu.memory_space<vmem>>, %arg4: memref<8x128xf32, #tpu.memory_space<vmem>>) attributes {dimension_semantics = [#tpu.dimension_semantics<parallel>], iteration_bounds = array<i64: 1>, scalar_prefetch = 0 : i64, scratch_operands = 0 : i64, tpu.core_type = #tpu.core_type<tc>, window_params = [{transform_indices = @transform_0, window_bounds = array<i64: 8, 128>}, {pipeline_mode = #tpu.pipeline_mode<synchronous>, transform_indices = @transform_1, window_bounds = array<i64: 576, 128>}, {pipeline_mode = #tpu.pipeline_mode<synchronous>, transform_indices = @transform_2, window_bounds = array<i64: 8, 128>}, {transform_indices = @transform_3, window_bounds = array<i64: 8, 128>}]} {
    %c0 = arith.constant 0 : index
    %c0_0 = arith.constant 0 : index
    %0 = vector.load %arg3[%c0, %c0_0] : memref<8x128xf32, #tpu.memory_space<vmem>>, vector<8x128xf32>
    %c0_1 = arith.constant 0 : index
    %c0_2 = arith.constant 0 : index
    %1 = vector.load %arg1[%c0_1, %c0_2] : memref<8x128xf32, #tpu.memory_space<vmem>>, vector<8x128xf32>
    %cst = arith.constant 4.000000e+00 : f32
    %2 = vector.broadcast %cst : f32 to vector<8x128xf32>
    %3 = arith.mulf %1, %2 : vector<8x128xf32>
    %4 = math.roundeven %3 : vector<8x128xf32>
    %cst_3 = arith.constant -8.000000e+00 : f32
    %cst_4 = arith.constant 7.000000e+00 : f32
    %5 = vector.broadcast %cst_3 : f32 to vector<8x128xf32>
    %6 = arith.maximumf %5, %4 : vector<8x128xf32>
    %7 = vector.broadcast %cst_4 : f32 to vector<8x128xf32>
    %8 = arith.minimumf %7, %6 : vector<8x128xf32>
    %c0_5 = arith.constant 0 : index
    %c0_6 = arith.constant 0 : index
    %9 = vector.load %arg2[%c0_5, %c0_6] : memref<576x128xf32, #tpu.memory_space<vmem>>, vector<128x128xf32>
    %cst_7 = arith.constant dense<0.000000e+00> : vector<8x128xf32>
    %10 = tpu.matmul %8, %9, %cst_7 {dimension_numbers = #tpu.dot_dimension_numbers<[1], [0], [0], [1], [0, 0, 1, 1], [], []>} : vector<8x128xf32>, vector<128x128xf32>, vector<8x128xf32> -> vector<8x128xf32>
    %11 = vector.extract_strided_slice %0 {offsets = [0, 0], sizes = [1, 128], strides = [1, 1]} : vector<8x128xf32> to vector<1x128xf32>
    %12 = vector.broadcast %11 : vector<1x128xf32> to vector<8x128xf32>
    %13 = arith.addf %10, %12 : vector<8x128xf32>
    %14 = math.roundeven %13 : vector<8x128xf32>
    %cst_8 = arith.constant 0.000000e+00 : f32
    %cst_9 = arith.constant 1.500000e+01 : f32
    %15 = vector.broadcast %cst_8 : f32 to vector<8x128xf32>
    %16 = arith.maximumf %15, %14 : vector<8x128xf32>
    %17 = vector.broadcast %cst_9 : f32 to vector<8x128xf32>
    %18 = arith.minimumf %17, %16 : vector<8x128xf32>
    %c128 = arith.constant 128 : index
    %c0_10 = arith.constant 0 : index
    %19 = vector.load %arg2[%c128, %c0_10] : memref<576x128xf32, #tpu.memory_space<vmem>>, vector<128x128xf32>
    %cst_11 = arith.constant dense<0.000000e+00> : vector<8x128xf32>
    %20 = tpu.matmul %18, %19, %cst_11 {dimension_numbers = #tpu.dot_dimension_numbers<[1], [0], [0], [1], [0, 0, 1, 1], [], []>} : vector<8x128xf32>, vector<128x128xf32>, vector<8x128xf32> -> vector<8x128xf32>
    %21 = vector.extract_strided_slice %0 {offsets = [1, 0], sizes = [1, 128], strides = [1, 1]} : vector<8x128xf32> to vector<1x128xf32>
    %22 = vector.broadcast %21 : vector<1x128xf32> to vector<8x128xf32>
    %23 = arith.addf %20, %22 : vector<8x128xf32>
    %24 = math.roundeven %23 : vector<8x128xf32>
    %cst_12 = arith.constant 0.000000e+00 : f32
    %cst_13 = arith.constant 1.500000e+01 : f32
    %25 = vector.broadcast %cst_12 : f32 to vector<8x128xf32>
    %26 = arith.maximumf %25, %24 : vector<8x128xf32>
    %27 = vector.broadcast %cst_13 : f32 to vector<8x128xf32>
    %28 = arith.minimumf %27, %26 : vector<8x128xf32>
    %29 = vector.extract_strided_slice %28 {offsets = [0, 0], sizes = [8, 64], strides = [1, 1]} : vector<8x128xf32> to vector<8x64xf32>
    %30 = vector.extract_strided_slice %28 {offsets = [0, 64], sizes = [8, 64], strides = [1, 1]} : vector<8x128xf32> to vector<8x64xf32>
    %31 = arith.maximumf %29, %30 : vector<8x64xf32>
    %c256 = arith.constant 256 : index
    %c0_14 = arith.constant 0 : index
    %32 = vector.load %arg2[%c256, %c0_14] : memref<576x128xf32, #tpu.memory_space<vmem>>, vector<64x128xf32>
    %cst_15 = arith.constant dense<0.000000e+00> : vector<8x128xf32>
    %33 = tpu.matmul %31, %32, %cst_15 {dimension_numbers = #tpu.dot_dimension_numbers<[1], [0], [0], [1], [0, 0, 1, 1], [], []>} : vector<8x64xf32>, vector<64x128xf32>, vector<8x128xf32> -> vector<8x128xf32>
    %34 = vector.extract_strided_slice %0 {offsets = [2, 0], sizes = [1, 128], strides = [1, 1]} : vector<8x128xf32> to vector<1x128xf32>
    %35 = vector.broadcast %34 : vector<1x128xf32> to vector<8x128xf32>
    %36 = arith.addf %33, %35 : vector<8x128xf32>
    %37 = math.roundeven %36 : vector<8x128xf32>
    %cst_16 = arith.constant 0.000000e+00 : f32
    %cst_17 = arith.constant 1.500000e+01 : f32
    %38 = vector.broadcast %cst_16 : f32 to vector<8x128xf32>
    %39 = arith.maximumf %38, %37 : vector<8x128xf32>
    %40 = vector.broadcast %cst_17 : f32 to vector<8x128xf32>
    %41 = arith.minimumf %40, %39 : vector<8x128xf32>
    %c320 = arith.constant 320 : index
    %c0_18 = arith.constant 0 : index
    %42 = vector.load %arg2[%c320, %c0_18] : memref<576x128xf32, #tpu.memory_space<vmem>>, vector<128x128xf32>
    %cst_19 = arith.constant dense<0.000000e+00> : vector<8x128xf32>
    %43 = tpu.matmul %41, %42, %cst_19 {dimension_numbers = #tpu.dot_dimension_numbers<[1], [0], [0], [1], [0, 0, 1, 1], [], []>} : vector<8x128xf32>, vector<128x128xf32>, vector<8x128xf32> -> vector<8x128xf32>
    %44 = vector.extract_strided_slice %0 {offsets = [3, 0], sizes = [1, 128], strides = [1, 1]} : vector<8x128xf32> to vector<1x128xf32>
    %45 = vector.broadcast %44 : vector<1x128xf32> to vector<8x128xf32>
    %46 = arith.addf %43, %45 : vector<8x128xf32>
    %47 = math.roundeven %46 : vector<8x128xf32>
    %cst_20 = arith.constant 0.000000e+00 : f32
    %cst_21 = arith.constant 1.500000e+01 : f32
    %48 = vector.broadcast %cst_20 : f32 to vector<8x128xf32>
    %49 = arith.maximumf %48, %47 : vector<8x128xf32>
    %50 = vector.broadcast %cst_21 : f32 to vector<8x128xf32>
    %51 = arith.minimumf %50, %49 : vector<8x128xf32>
    %c448 = arith.constant 448 : index
    %c0_22 = arith.constant 0 : index
    %52 = vector.load %arg2[%c448, %c0_22] : memref<576x128xf32, #tpu.memory_space<vmem>>, vector<128x128xf32>
    %cst_23 = arith.constant dense<0.000000e+00> : vector<8x128xf32>
    %53 = tpu.matmul %51, %52, %cst_23 {dimension_numbers = #tpu.dot_dimension_numbers<[1], [0], [0], [1], [0, 0, 1, 1], [], []>} : vector<8x128xf32>, vector<128x128xf32>, vector<8x128xf32> -> vector<8x128xf32>
    %54 = vector.extract_strided_slice %0 {offsets = [4, 0], sizes = [1, 128], strides = [1, 1]} : vector<8x128xf32> to vector<1x128xf32>
    %55 = vector.broadcast %54 : vector<1x128xf32> to vector<8x128xf32>
    %56 = arith.addf %53, %55 : vector<8x128xf32>
    %57 = math.roundeven %56 : vector<8x128xf32>
    %cst_24 = arith.constant -8.000000e+00 : f32
    %cst_25 = arith.constant 7.000000e+00 : f32
    %58 = vector.broadcast %cst_24 : f32 to vector<8x128xf32>
    %59 = arith.maximumf %58, %57 : vector<8x128xf32>
    %60 = vector.broadcast %cst_25 : f32 to vector<8x128xf32>
    %61 = arith.minimumf %60, %59 : vector<8x128xf32>
    %cst_26 = arith.constant 2.500000e-01 : f32
    %62 = vector.broadcast %cst_26 : f32 to vector<8x128xf32>
    %63 = arith.mulf %61, %62 : vector<8x128xf32>
    %c0_27 = arith.constant 0 : index
    %c0_28 = arith.constant 0 : index
    %64 = vector.load %arg4[%c0_27, %c0_28] : memref<8x128xf32, #tpu.memory_space<vmem>>, vector<8x128xf32>
    tpu.vector_store %arg4[%c0_27, %c0_28], %63 {strides = array<i32>} : memref<8x128xf32, #tpu.memory_space<vmem>>, vector<8x128xf32>,
    return
  }
  func.func @transform_0(%arg0: i32) -> (i32, i32) {
    %c0_i32 = arith.constant 0 : i32
    %c0_i32_0 = arith.constant 0 : i32
    return %arg0, %c0_i32 : i32, i32
  }
  func.func @transform_1(%arg0: i32) -> (i32, i32) {
    %c0_i32 = arith.constant 0 : i32
    %c0_i32_0 = arith.constant 0 : i32
    %c0_i32_1 = arith.constant 0 : i32
    return %c0_i32, %c0_i32_0 : i32, i32
  }
  func.func @transform_2(%arg0: i32) -> (i32, i32) {
    %c0_i32 = arith.constant 0 : i32
    %c0_i32_0 = arith.constant 0 : i32
    %c0_i32_1 = arith.constant 0 : i32
    return %c0_i32, %c0_i32_0 : i32, i32
  }
  func.func @transform_3(%arg0: i32) -> (i32, i32) {
    %c0_i32 = arith.constant 0 : i32
    %c0_i32_0 = arith.constant 0 : i32
    return %arg0, %c0_i32 : i32, i32
  }
}

</mosaic_0001>

<bundles_post_ra>
// kernel: _lambda_.1
= control target key start
LH: loop header
LB: loop body
LE: loop exit
PB: predicated region body
PF: predicated region fallthrough
CT: control target
= control target key end

     0   :  { %8 = vsyncpa [#allocation3], 0  ;;  %s889_s12 = smov [#allocation2]   ;;  %s997_s0 = inlined_call_operand.vmem [shape: f32[8,128], index: 0, kind: input, shape index: {}]   ;;  %s998_s1 = inlined_call_operand.hbm [shape: f32[576,128], index: 1, kind: input, shape index: {}]   ;;  %s999_s2 = inlined_call_operand.vmem [shape: f32[8,128], index: 2, kind: input, shape index: {}]   ;;  %s1000_s3 = inlined_call_operand.vmem [shape: f32[8,128], index: 3, kind: output, shape index: {}]  }
   0x1   :  { %s16_s13 = sshll.u32 %s889_s12, 4  ;;  %s865_s16 = scalar_lea.hbm %s998_s1, 9216  ;;  %s17_s13 = int_to_ptr.vmem [resolvable:$true] %s16_s13 }
   0x2   :  { %p866_p0 = scmp.ne.s32.totalorder %s998_s1, %s865_s16  ;;  %p869_p1 = scmp.lt.u32.totalorder %s865_s16, %s998_s1 }
   0x4   :  { %p871_p2 = pnand %p869_p1, %p866_p0 }
   0x6   :  { %874 = shalt.err (!%p871_p2)
}
   0x7   :  { %s875_s21 = scalar_lea.vmem %s17_s13, 9216  ;;  %p880_p4 = scmp.lt.s32.totalorder %s17_s13, %s17_s13 }
   0x8   :  { %p876_p3 = scmp.ne.s32.totalorder %s17_s13, %s875_s21  ;;  %p881_p5 = scmp.lt.s32.totalorder %s875_s21, %s875_s21 }
   0xa   :  { %p882_p6 = por %p881_p5, %p880_p4 }
   0xc   :  { %p883_p7 = pnand %p882_p6, %p876_p3 }
   0xe   :  { %886 = shalt.err (!%p883_p7)
}
   0xf   :  { %s890_s22 = smov 128   ;;  %s891_s23 = smov 8  }
  0x10   :  { %22 = dma.hbm_to_vmem [thread:$0]  %s998_s1, 9216, %s17_s13, [#allocation3], %s890_s22, %s890_s22, %s891_s23  }
  0x11   :  { %887 = dma.done.wait [#allocation3], 9216  }
  0x12   :  { %888 = vsyncadd [#allocation3], 4294958080  ;;  %v892_v0 = vmov 0.0|0.0   ;;  %vm893_vm0 = vmmov 0   ;;  %v894_v1 = vmov 0.0   ;;  %v34_v2 = vld [vmem:[#allocation2] sm:$0xff]  ;;  %v50_v55 = vlaneseq }
  0x13   :  { %744 = vmatprep.subr.bf16.mxu0 %v892_v0  ;;  %617 = vmatprep.mubr.msk.f32.mxu0 %vm893_vm0, %v894_v1  ;;  %v35_v3 = vld [vmem:[#allocation2 + $0x8] sm:$0xff]  ;;  %v36_v4 = vld [vmem:[#allocation2 + $0x10] sm:$0xff]  ;;  %v37_v6 = vld [vmem:[#allocation2 + $0x18] sm:$0xff]  ;;  %vm237_vm1 = vcmask 523264  }
  0x14   :  { %768 = vmatprep.subr.bf16.mxu1 %v892_v0  ;;  %652 = vmatprep.mubr.msk.f32.mxu1 %vm893_vm0, %v894_v1  ;;  %v745_v5 = vpack.c.bf16 %v35_v3, %v34_v2  ;;  %v748_v7 = vpack.c.bf16 %v37_v6, %v36_v4  ;;  %v38_v8 = vld [vmem:[#allocation2 + $0x20] sm:$0xff]  ;;  %v39_v9 = vld [vmem:[#allocation2 + $0x28] sm:$0xff]  ;;  %v129_v12 = vld [vmem:[#allocation2 + $0x90] sm:$0xff]  ;;  %v955_v56 = vshrl.u32 %v50_v55, 7 }
  0x15   :  { %v127_v10 = vld [vmem:[#allocation2 + $0x80] sm:$0xff]  ;;  %v128_v11 = vld [vmem:[#allocation2 + $0x88] sm:$0xff]  ;;  %v130_v13 = vld [vmem:[#allocation2 + $0x98] sm:$0xff]  ;;  %v751_v14 = vpack.c.bf16 %v39_v9, %v38_v8 }
  0x16   :  { %746 = vmatpush3.bf16.msra.mxu0 %v745_v5  ;;  %v769_v15 = vpack.c.bf16 %v128_v11, %v127_v10  ;;  %v40_v16 = vld [vmem:[#allocation2 + $0x30] sm:$0xff]  ;;  %v41_v17 = vld [vmem:[#allocation2 + $0x38] sm:$0xff]  ;;  %v772_v18 = vpack.c.bf16 %v130_v13, %v129_v12  ;;  %v131_v19 = vld [vmem:[#allocation2 + $0xa0] sm:$0xff]  ;;  %v52_v57 = vsub.s32 0, %v955_v56 }
  0x17   :  { %747 = vmatprep.subr.bf16.mxu0 %v892_v0  ;;  %v132_v20 = vld [vmem:[#allocation2 + $0xa8] sm:$0xff]  ;;  %v754_v21 = vpack.c.bf16 %v41_v17, %v40_v16  ;;  %v42_v22 = vld [vmem:[#allocation2 + $0x40] sm:$0xff]  ;;  %v133_v25 = vld [vmem:[#allocation2 + $0xb0] sm:$0xff] }
  0x18   :  { %770 = vmatpush3.bf16.msra.mxu1 %v769_v15  ;;  %v43_v23 = vld [vmem:[#allocation2 + $0x48] sm:$0xff]  ;;  %v775_v24 = vpack.c.bf16 %v132_v20, %v131_v19  ;;  %v134_v26 = vld [vmem:[#allocation2 + $0xb8] sm:$0xff]  ;;  %v29_v28 = vld [vmem:[%s997_s0] sm:$0xff]  ;;  %v145_v15 = vsub.s32 1, %v955_v56 }
  0x19   :  { %771 = vmatprep.subr.bf16.mxu1 %v892_v0  ;;  %v757_v27 = vpack.c.bf16 %v43_v23, %v42_v22  ;;  %v44_v29 = vld [vmem:[#allocation2 + $0x50] sm:$0xff]  ;;  %v45_v30 = vld [vmem:[#allocation2 + $0x58] sm:$0xff]  ;;  %v778_v31 = vpack.c.bf16 %v134_v26, %v133_v25  ;;  %v30_v32 = vmul.f32 4.0, %v29_v28  ;;  %v135_v33 = vld [vmem:[#allocation2 + $0xc0] sm:$0xff] }
  0x1a   :  { %749 = vmatpush3.bf16.msra.mxu0 %v748_v7  ;;  %v136_v34 = vld [vmem:[#allocation2 + $0xc8] sm:$0xff]  ;;  %v760_v35 = vpack.c.bf16 %v45_v30, %v44_v29  ;;  %v46_v36 = vld [vmem:[#allocation2 + $0x60] sm:$0xff]  ;;  %v137_v40 = vld [vmem:[#allocation2 + $0xd0] sm:$0xff] }
  0x1b   :  { %750 = vmatprep.subr.bf16.mxu0 %v892_v0  ;;  %v47_v37 = vld [vmem:[#allocation2 + $0x68] sm:$0xff]  ;;  %v781_v38 = vpack.c.bf16 %v136_v34, %v135_v33  ;;  %v852_v39 = vround.rtne.f32 %v30_v32  ;;  %v138_v41 = vld [vmem:[#allocation2 + $0xd8] sm:$0xff]  ;;  %v48_v43 = vld [vmem:[#allocation2 + $0x70] sm:$0xff] }
  0x1c   :  { %773 = vmatpush3.bf16.msra.mxu1 %v772_v18  ;;  %v763_v42 = vpack.c.bf16 %v47_v37, %v46_v36  ;;  %v49_v44 = vld [vmem:[#allocation2 + $0x78] sm:$0xff]  ;;  %v784_v45 = vpack.c.bf16 %v138_v41, %v137_v40  ;;  %v139_v49 = vld [vmem:[#allocation2 + $0xe0] sm:$0xff]  ;;  %v140_v50 = vld [vmem:[#allocation2 + $0xe8] sm:$0xff] }
  0x1d   :  { %774 = vmatprep.subr.bf16.mxu1 %v892_v0  ;;  %v32_v46 = vmax.f32 %v852_v39, -8.0  ;;  %v766_v47 = vpack.c.bf16 %v49_v44, %v48_v43  ;;  %v787_v51 = vpack.c.bf16 %v140_v50, %v139_v49  ;;  %v141_v52 = vld [vmem:[#allocation2 + $0xf0] sm:$0xff]  ;;  %v142_v53 = vld [vmem:[#allocation2 + $0xf8] sm:$0xff]  ;;  %v961_v58 = vld [vmem:[%s999_s2] sm:$0xff]  ;;  %s895_s2 = smov 64  }
  0x1e   :  { %752 = vmatpush3.bf16.msra.mxu0 %v751_v14  ;;  %v790_v54 = vpack.c.bf16 %v142_v53, %v141_v52  ;;  %v53_v59 = vrot.slane %v961_v58, %v52_v57  ;;  %v225_v4 = vld [vmem:[#allocation2 + $0x100] sm:$0xff]  ;;  %v226_v5 = vld [vmem:[#allocation2 + $0x108] sm:$0xff]  ;;  %v227_v6 = vld [vmem:[#allocation2 + $0x110] sm:$0xff]  ;;  %v146_v17 = vrot.slane %v961_v58, %v145_v15 }
  0x1f   :  { %753 = vmatprep.subr.bf16.mxu0 %v892_v0  ;;  %v33_v48 = vmin.f32 %v32_v46, 7.0  ;;  %v793_v7 = vpack.c.bf16 %v226_v5, %v225_v4  ;;  %v228_v8 = vld [vmem:[#allocation2 + $0x118] sm:$0xff]  ;;  %v229_v10 = vld [vmem:[#allocation2 + $0x120] sm:$0xff]  ;;  %v230_v11 = vld [vmem:[#allocation2 + $0x128] sm:$0xff] }
  0x20   :  { %776 = vmatpush3.bf16.msra.mxu1 %v775_v24  ;;  %v796_v9 = vpack.c.bf16 %v228_v8, %v227_v6  ;;  %v799_v12 = vpack.c.bf16 %v230_v11, %v229_v10  ;;  %v231_v13 = vld [vmem:[#allocation2 + $0x130] sm:$0xff]  ;;  %v232_v14 = vld [vmem:[#allocation2 + $0x138] sm:$0xff]  ;;  %v314_v18 = vld [vmem:[#allocation2 + $0x140] sm:$0xff] }
  0x21   :  { %777 = vmatprep.subr.bf16.mxu1 %v892_v0  ;;  %v802_v16 = vpack.c.bf16 %v232_v14, %v231_v13  ;;  %v315_v19 = vld [vmem:[#allocation2 + $0x148] sm:$0xff]  ;;  %v316_v20 = vld [vmem:[#allocation2 + $0x150] sm:$0xff]  ;;  %v317_v22 = vld [vmem:[#allocation2 + $0x158] sm:$0xff] }
  0x22   :  { %755 = vmatpush3.bf16.msra.mxu0 %v754_v21  ;;  %v805_v21 = vpack.c.bf16 %v315_v19, %v314_v18  ;;  %v808_v26 = vpack.c.bf16 %v317_v22, %v316_v20  ;;  %v319_v28 = vld [vmem:[#allocation2 + $0x168] sm:$0xff]  ;;  %v320_v32 = vld [vmem:[#allocation2 + $0x170] sm:$0xff]  ;;  %v321_v33 = vld [vmem:[#allocation2 + $0x178] sm:$0xff] }
  0x23   :  { %756 = vmatprep.subr.bf16.mxu0 %v892_v0  ;;  %v322_v36 = vld [vmem:[#allocation2 + $0x180] sm:$0xff]  ;;  %v323_v37 = vld [vmem:[#allocation2 + $0x188] sm:$0xff]  ;;  %v324_v39 = vld [vmem:[#allocation2 + $0x190] sm:$0xff] }
  0x24   :  { %779 = vmatpush3.bf16.msra.mxu1 %v778_v31  ;;  %v325_v40 = vld [vmem:[#allocation2 + $0x198] sm:$0xff]  ;;  %v326_v44 = vld [vmem:[#allocation2 + $0x1a0] sm:$0xff]  ;;  %v409_v52 = vld [vmem:[#allocation2 + $0x1d0] sm:$0xff] }
  0x25   :  { %780 = vmatprep.subr.bf16.mxu1 %v892_v0  ;;  %v820_v41 = vpack.c.bf16 %v325_v40, %v324_v39  ;;  %v407_v50 = vld [vmem:[#allocation2 + $0x1c0] sm:$0xff]  ;;  %v412_v57 = vld [vmem:[#allocation2 + $0x1e8] sm:$0xff]  ;;  %v417_v4 = vld [vmem:[#allocation2 + $0x210] sm:$0xff] }
  0x26   :  { %758 = vmatpush3.bf16.msra.mxu0 %v757_v27  ;;  %v318_v27 = vld [vmem:[#allocation2 + $0x160] sm:$0xff]  ;;  %v418_v5 = vld [vmem:[#allocation2 + $0x218] sm:$0xff]  ;;  %v421_v18 = vld [vmem:[#allocation2 + $0x230] sm:$0xff] }
  0x27   :  { %759 = vmatprep.subr.bf16.mxu0 %v892_v0  ;;  %v811_v31 = vpack.c.bf16 %v319_v28, %v318_v27  ;;  %v844_v6 = vpack.c.bf16 %v418_v5, %v417_v4  ;;  %v419_v15 = vld [vmem:[#allocation2 + $0x220] sm:$0xff]  ;;  %v422_v19 = vld [vmem:[#allocation2 + $0x238] sm:$0xff] }
  0x28   :  { %782 = vmatpush3.bf16.msra.mxu1 %v781_v38  ;;  %v817_v38 = vpack.c.bf16 %v323_v37, %v322_v36  ;;  %v850_v20 = vpack.c.bf16 %v422_v19, %v421_v18 }
  0x29   :  { %783 = vmatprep.subr.bf16.mxu1 %v892_v0 }
  0x2a   :  { %761 = vmatpush3.bf16.msra.mxu0 %v760_v35  ;;  %v814_v35 = vpack.c.bf16 %v321_v33, %v320_v32 }
  0x2b   :  { %762 = vmatprep.subr.bf16.mxu0 %v892_v0 }
  0x2c   :  { %785 = vmatpush3.bf16.msra.mxu1 %v784_v45  ;;  %v327_v45 = vld [vmem:[#allocation2 + $0x1a8] sm:$0xff] }
  0x2d   :  { %786 = vmatprep.subr.bf16.mxu1 %v892_v0  ;;  %v823_v46 = vpack.c.bf16 %v327_v45, %v326_v44 }
  0x2e   :  { %764 = vmatpush3.bf16.msra.mxu0 %v763_v42 }
  0x2f   :  { %765 = vmatprep.subr.bf16.mxu0 %v892_v0 }
  0x30   :  { %788 = vmatpush3.bf16.msra.mxu1 %v787_v51  ;;  %v408_v51 = vld [vmem:[#allocation2 + $0x1c8] sm:$0xff] }
  0x31   :  { %789 = vmatprep.subr.bf16.mxu1 %v892_v0  ;;  %v829_v53 = vpack.c.bf16 %v408_v51, %v407_v50 }
  0x32   :  { %767 = vmatpush3.bf16.msra.mxu0 %v766_v47  ;;  %v328_v47 = vld [vmem:[#allocation2 + $0x1b0] sm:$0xff] }
  0x33   :  { %792 = vmatprep.subr.bf16.mxu0 %v892_v0 }
  0x34   :  { %791 = vmatpush3.bf16.msra.mxu1 %v790_v54  ;;  %v410_v54 = vld [vmem:[#allocation2 + $0x1d8] sm:$0xff] }
  0x35   :  { %618 = vmatmul.mubr.f32.vlgmr.msra.gmra.mrb[0].mxu0 %v33_v48  ;;  %804 = vmatprep.subr.bf16.mxu1 %v892_v0  ;;  %v329_v48 = vld [vmem:[#allocation2 + $0x1b8] sm:$0xff]  ;;  %v832_v55 = vpack.c.bf16 %v410_v54, %v409_v52 }
  0x36   :  { %671 = vmatprep.mubr.msk.f32.mxu0 %vm893_vm0, %v894_v1  ;;  %794 = vmatpush3.bf16.msra.mxu0 %v793_v7  ;;  %v826_v49 = vpack.c.bf16 %v329_v48, %v328_v47  ;;  %v235_v7 = vsub.s32 2, %v955_v56 }
  0x37   :  { %795 = vmatprep.subr.bf16.mxu0 %v892_v0 }
  0x38   :  { %v236_v8 = vrot.slane %v961_v58, %v235_v7 }
  0x3a   :  { %797 = vmatpush3.bf16.msra.mxu0 %v796_v9 }
  0x3b   :  { %798 = vmatprep.subr.bf16.mxu0 %v892_v0 }
  0x3e   :  { %800 = vmatpush3.bf16.msra.mxu0 %v799_v12 }
  0x3f   :  { %801 = vmatprep.subr.bf16.mxu0 %v892_v0 }
  0x42   :  { %803 = vmatpush3.bf16.msra.mxu0 %v802_v16  ;;  %v420_v16 = vld [vmem:[#allocation2 + $0x228] sm:$0xff] }
  0x43   :  { %828 = vmatprep.subr.bf16.mxu0 %v892_v0 }
 0x108   :  { %v120_v60 = vpop.f32.mrb[0].mxu0 }
 0x109   :  { %v121_v61 = vadd.f32 %v120_v60, %v53_v59  ;;  %v619_v62 = vpop.f32.mrb[1].mxu0  ;;  %v413_v60 = vld [vmem:[#allocation2 + $0x1f0] sm:$0xff] }
 0x10b   :  { %v853_v63 = vround.rtne.f32 %v121_v61  ;;  %v414_v61 = vld [vmem:[#allocation2 + $0x1f8] sm:$0xff] }
 0x10c   :  { %v838_v62 = vpack.c.bf16 %v414_v61, %v413_v60 }
 0x10d   :  { %v125_v2 = vmax.f32 %v853_v63, 0.0  ;;  %v415_v63 = vld [vmem:[#allocation2 + $0x200] sm:$0xff] }
 0x10f   :  { %v126_v3 = vmin.f32 %v125_v2, 15.0  ;;  %v416_v2 = vld [vmem:[#allocation2 + $0x208] sm:$0xff] }
 0x111   :  { %653 = vmatmul.mubr.f32.vlgmr.msra.gmra.mrb[0].mxu1 %v126_v3  ;;  %v841_v3 = vpack.c.bf16 %v416_v2, %v415_v63 }
 0x112   :  { %706 = vmatprep.mubr.msk.f32.mxu1 %vm893_vm0, %v894_v1  ;;  %806 = vmatpush3.bf16.msra.mxu1 %v805_v21  ;;  %v332_v21 = vsub.s32 3, %v955_v56 }
 0x113   :  { %807 = vmatprep.subr.bf16.mxu1 %v892_v0 }
 0x114   :  { %v333_v22 = vrot.slane %v961_v58, %v332_v21 }
 0x116   :  { %809 = vmatpush3.bf16.msra.mxu1 %v808_v26 }
 0x117   :  { %810 = vmatprep.subr.bf16.mxu1 %v892_v0 }
 0x11a   :  { %812 = vmatpush3.bf16.msra.mxu1 %v811_v31 }
 0x11b   :  { %813 = vmatprep.subr.bf16.mxu1 %v892_v0 }
 0x11e   :  { %815 = vmatpush3.bf16.msra.mxu1 %v814_v35 }
 0x11f   :  { %816 = vmatprep.subr.bf16.mxu1 %v892_v0 }
 0x122   :  { %818 = vmatpush3.bf16.msra.mxu1 %v817_v38 }
 0x123   :  { %819 = vmatprep.subr.bf16.mxu1 %v892_v0 }
 0x126   :  { %821 = vmatpush3.bf16.msra.mxu1 %v820_v41 }
 0x127   :  { %822 = vmatprep.subr.bf16.mxu1 %v892_v0 }
 0x12a   :  { %824 = vmatpush3.bf16.msra.mxu1 %v823_v46 }
 0x12b   :  { %825 = vmatprep.subr.bf16.mxu1 %v892_v0 }
 0x12e   :  { %827 = vmatpush3.bf16.msra.mxu1 %v826_v49 }
 0x1e4   :  { %v213_v23 = vpop.f32.mrb[0].mxu1 }
 0x1e5   :  { %v214_v24 = vadd.f32 %v213_v23, %v146_v17  ;;  %v654_v25 = vpop.f32.mrb[1].mxu1  ;;  %v847_v17 = vpack.c.bf16 %v420_v16, %v419_v15 }
 0x1e7   :  { %v854_v29 = vround.rtne.f32 %v214_v24 }
 0x1e9   :  { %v218_v30 = vmax.f32 %v854_v29, 0.0  ;;  %v425_v29 = vsub.s32 4, %v955_v56 }
 0x1eb   :  { %v219_v34 = vmin.f32 %v218_v30, 15.0  ;;  %v426_v30 = vrot.slane %v961_v58, %v425_v29 }
 0x1ed   :  { %221 = vrot.lane.b32.xlu0 %v219_v34, %s895_s2 }
 0x25f   :  { %v222_v42 = vpop.permute.xlu0 %221 }
 0x260   :  { %v224_v43 = vmax.f32 %v219_v34, %v222_v42 }
 0x262   :  { %672 = vmatmul.mubr.msk.f32.vlgmr.msra.gmra.mrb[2].mxu0 %vm237_vm1, %v224_v43 }
 0x263   :  { %741 = vmatprep.mubr.msk.f32.mxu0 %vm893_vm0, %v894_v1  ;;  %830 = vmatpush3.bf16.msra.mxu0 %v829_v53  ;;  %v411_v1 = vld [vmem:[#allocation2 + $0x1e0] sm:$0xff] }
 0x264   :  { %831 = vmatprep.subr.bf16.mxu0 %v892_v0  ;;  %v835_v59 = vpack.c.bf16 %v412_v57, %v411_v1 }
 0x267   :  { %833 = vmatpush3.bf16.msra.mxu0 %v832_v55 }
 0x268   :  { %834 = vmatprep.subr.bf16.mxu0 %v892_v0 }
 0x26b   :  { %836 = vmatpush3.bf16.msra.mxu0 %v835_v59 }
 0x26c   :  { %837 = vmatprep.subr.bf16.mxu0 %v892_v0 }
 0x26f   :  { %839 = vmatpush3.bf16.msra.mxu0 %v838_v62 }
 0x270   :  { %840 = vmatprep.subr.bf16.mxu0 %v892_v0 }
 0x273   :  { %842 = vmatpush3.bf16.msra.mxu0 %v841_v3 }
 0x274   :  { %843 = vmatprep.subr.bf16.mxu0 %v892_v0 }
 0x277   :  { %845 = vmatpush3.bf16.msra.mxu0 %v844_v6 }
 0x278   :  { %846 = vmatprep.subr.bf16.mxu0 %v892_v0 }
 0x27b   :  { %848 = vmatpush3.bf16.msra.mxu0 %v847_v17 }
 0x27c   :  { %849 = vmatprep.subr.bf16.mxu0 %v892_v0 }
 0x27f   :  { %851 = vmatpush3.bf16.msra.mxu0 %v850_v20 }
 0x335   :  { %v307_v9 = vpop.f32.mrb[2].mxu0 }
 0x336   :  { %v308_v10 = vadd.f32 %v307_v9, %v236_v8  ;;  %v673_v11 = vpop.f32.mrb[3].mxu0 }
 0x338   :  { %v855_v12 = vround.rtne.f32 %v308_v10 }
 0x33a   :  { %v312_v13 = vmax.f32 %v855_v12, 0.0 }
 0x33c   :  { %v313_v14 = vmin.f32 %v312_v13, 15.0 }
 0x33e   :  { %707 = vmatmul.mubr.f32.vlgmr.msra.gmra.mrb[2].mxu1 %v313_v14 }
 0x411   :  { %v400_v23 = vpop.f32.mrb[2].mxu1 }
 0x412   :  { %v401_v24 = vadd.f32 %v400_v23, %v333_v22  ;;  %v708_v25 = vpop.f32.mrb[3].mxu1 }
 0x414   :  { %v856_v26 = vround.rtne.f32 %v401_v24 }
 0x416   :  { %v405_v27 = vmax.f32 %v856_v26, 0.0 }
 0x418   :  { %v406_v28 = vmin.f32 %v405_v27, 15.0 }
 0x41a   :  { %742 = vmatmul.mubr.f32.vlgmr.msra.gmra.mrb[4].mxu0 %v406_v28 }
 0x4ed   :  { %v493_v0 = vpop.f32.mrb[4].mxu0 }
 0x4ee   :  { %v494_v31 = vadd.f32 %v493_v0, %v426_v30  ;;  %v743_v32 = vpop.f32.mrb[5].mxu0 }
 0x4f0   :  { %v857_v33 = vround.rtne.f32 %v494_v31 }
 0x4f2   :  { %v498_v34 = vmax.f32 %v857_v33, -8.0 }
 0x4f4   :  { %v499_v35 = vmin.f32 %v498_v34, 7.0 }
 0x4f6   :  { %v500_v36 = vmul.f32 0.25, %v499_v35 }
 0x4f8   :  { %501 = vst [vmem:[%s1000_s3] sm:$0xff] %v500_v36 }
 0x4f9   :  { %506 = vsyncpa [#allocation3], 1 }

</bundles_post_ra>
